<compile_context>
chip_gen: v7x
topology: tpu7x:2x2x1
jax: 0.10.0
libtpu: 0.0.40
codegen_flags: <defaults>
</compile_context>

<pallas_src>
import functools

import jax
import jax.numpy as jnp
from jax.experimental import pallas as pl
from jax.experimental.pallas import tpu as pltpu


def _moe_kernel(x_ref, noise_ref, w_ref, b_ref, y_ref, gsum_ref, *,
                num_experts, expert_dim):
    E, ed = num_experts, expert_dim

    x = x_ref[...].astype(jnp.float32)                     # (B_blk, D_in)

    # Single fused MXU call: all experts + the gate share one matmul.
    # Column layout of r: [ expert0 | expert1 | ... | gate logits ].
    r = jnp.dot(x, w_ref[...], preferred_element_type=jnp.float32) + b_ref[...]

    logits = r[:, E * ed:E * ed + E] + noise_ref[...].astype(jnp.float32)

    if E == 2:
        # softmax over 2 logits == sigmoid of the difference (one EUP op).
        p0 = jax.nn.sigmoid(logits[:, 0:1] - logits[:, 1:2])
        probs = jnp.concatenate([p0, 1.0 - p0], axis=-1)   # (B_blk, 2)
    else:
        probs = jax.nn.softmax(logits, axis=-1)            # (B_blk, E)

    # Per-block gate-prob sums; the load-balance loss is finished in the
    # wrapper (keeps the grid axis fully parallel).
    gsum_ref[...] = jnp.sum(probs, axis=0, keepdims=True).reshape(1, 1, E)

    # Top-1 routing; ties pick the lowest expert index (torch.topk keeps the
    # first maximum).
    pmax = jnp.max(probs, axis=-1, keepdims=True)          # (B_blk, 1)
    out = jnp.zeros((x.shape[0], ed), jnp.float32)
    taken = jnp.zeros((x.shape[0], 1), jnp.bool_)
    for e in range(E):                                     # tiny unroll (E experts)
        pe = probs[:, e:e + 1]
        hit = jnp.logical_and(pe >= pmax, jnp.logical_not(taken))
        w_e = jnp.where(hit, pe, 0.0)                      # (B_blk, 1)
        out = out + w_e * r[:, e * ed:(e + 1) * ed]
        taken = jnp.logical_or(taken, hit)

    # output = output.repeat(1, num_experts): tile along the feature axis and
    # store the whole (B_blk, E*ed) tile once (lane-dense).
    y_ref[...] = jnp.concatenate([out] * E, axis=-1).astype(y_ref.dtype)


def _pick_batch_block(batch, d_in, d_out):
    """Rows per grid step: sublane-aligned, VMEM-budgeted, and (when possible)
    at least two grid steps so both v7x TensorCores get 'parallel' work."""
    per_row = 2 * 4 * (d_in + d_out)            # double-buffered f32 x + y rows
    cap = max(8, min(512, (8 << 20) // max(per_row, 1)))
    if batch >= 16:
        cap = min(cap, batch // 2)
    cap = min(cap, batch)
    for cand in range(cap, 7, -1):
        if batch % cand == 0 and cand % 8 == 0:
            return cand
    return batch                                # fallback: one block = full batch


def moe_forward(x, params, noise=None, *, num_experts=2, topk=1, noise_std=0.1):
    """x: (B, input_dim). Returns (output (B, output_dim), load_balance_loss)."""
    assert topk == 1, "kernel implements top-1 routing (module default)"
    B, d_in = x.shape
    E = num_experts

    gate_w = params["gate_w"]                   # (E, D_in)   (torch Linear layout)
    gate_b = params["gate_b"]                   # (E,)
    exp_w = params["exp_w"]                     # (E, ed, D_in)
    exp_b = params["exp_b"]                     # (E, ed)
    ed = exp_w.shape[1]
    out_dim = E * ed
    cols = out_dim + E                          # fused matmul width

    if noise is None or noise_std <= 0:
        noise = jnp.zeros((B, E), jnp.float32)

    # Fold all expert weights + the gate into one (D_in, E*ed + E) RHS so the
    # kernel needs a single MXU matmul per tile.
    w_stack = jnp.concatenate(
        [jnp.transpose(exp_w[e]) for e in range(E)] + [jnp.transpose(gate_w)],
        axis=1).astype(jnp.float32)
    b_stack = jnp.concatenate(
        [exp_b[e] for e in range(E)] + [gate_b], axis=0
    ).reshape(1, cols).astype(jnp.float32)

    B_blk = _pick_batch_block(B, d_in, out_dim)
    NB = B // B_blk

    kern = functools.partial(_moe_kernel, num_experts=E, expert_dim=ed)

    y, gsums = pl.pallas_call(
        kern,
        out_shape=(
            jax.ShapeDtypeStruct((B, out_dim), x.dtype),
            jax.ShapeDtypeStruct((NB, 1, E), jnp.float32),
        ),
        grid_spec=pltpu.PrefetchScalarGridSpec(
            num_scalar_prefetch=0,
            grid=(NB,),
            in_specs=[
                pl.BlockSpec((B_blk, d_in), lambda i: (i, 0)),    # x tile
                pl.BlockSpec((B_blk, E), lambda i: (i, 0)),       # gate noise
                pl.BlockSpec((d_in, cols), lambda i: (0, 0)),     # fused weights
                pl.BlockSpec((1, cols), lambda i: (0, 0)),        # fused biases
            ],
            out_specs=[
                pl.BlockSpec((B_blk, out_dim), lambda i: (i, 0)),
                pl.BlockSpec((1, 1, E), lambda i: (i, 0, 0)),
            ],
        ),
        compiler_params=pltpu.CompilerParams(dimension_semantics=("parallel",)),
    )(x, noise, w_stack, b_stack)

    # load_balance_loss = mean_e((mean_b(probs) - 1/E)^2) * E
    mean_p = jnp.sum(gsums[:, 0, :], axis=0) / B
    lb_loss = jnp.mean((mean_p - 1.0 / E) ** 2) * E
    return y, lb_loss


if __name__ == "__main__":
    num_experts = 2
    topk = 1
    noise_std = 0.1
    B, input_dim, output_dim = 16, 32, 64
    ed = output_dim // num_experts

    key = jax.random.PRNGKey(0)
    ks = jax.random.split(key, 5)

    x = jax.random.normal(ks[0], (B, input_dim), jnp.float32)

    params = {
        # nn.Linear stores weight as (out_features, in_features)
        "gate_w": jax.random.normal(ks[1], (num_experts, input_dim),
                                    jnp.float32) * 0.3,
        "gate_b": jax.random.uniform(ks[2], (num_experts,), jnp.float32,
                                     minval=-0.1, maxval=0.1),
        # experts: xavier_uniform_ weights, zero bias (matches reference init)
        "exp_w": jax.random.uniform(ks[3], (num_experts, ed, input_dim),
                                    jnp.float32, minval=-1.0, maxval=1.0)
                 * jnp.sqrt(6.0 / (input_dim + ed)),
        "exp_b": jnp.zeros((num_experts, ed), jnp.float32),
    }

    # gate noise (torch.randn_like(gate_logits) * noise_std), host-generated
    noise = jax.random.normal(ks[4], (B, num_experts), jnp.float32) * noise_std

    fwd = jax.jit(functools.partial(moe_forward, num_experts=num_experts,
                                    topk=topk, noise_std=noise_std))
    y, lb_loss = fwd(x, params, noise)
    jax.block_until_ready((y, lb_loss))
    assert y.shape == (B, output_dim)
    assert lb_loss.shape == ()
    print("KERNEL_OK")
</pallas_src>

<mosaic_0001>
module attributes {stable_mosaic.version = 11 : i64} {
  func.func @_moe_kernel(%arg0: i32, %arg1: memref<8x32xf32, #tpu.memory_space<vmem>>, %arg2: memref<8x2xf32, #tpu.memory_space<vmem>>, %arg3: memref<32x66xf32, #tpu.memory_space<vmem>>, %arg4: memref<1x66xf32, #tpu.memory_space<vmem>>, %arg5: memref<8x64xf32, #tpu.memory_space<vmem>>, %arg6: memref<1x1x2xf32, #tpu.memory_space<vmem>>) attributes {dimension_semantics = [#tpu.dimension_semantics<parallel>], iteration_bounds = array<i64: 2>, scalar_prefetch = 0 : i64, scratch_operands = 0 : i64, tpu.core_type = #tpu.core_type<tc>, window_params = [{transform_indices = @transform_0, window_bounds = array<i64: 8, 32>}, {transform_indices = @transform_1, window_bounds = array<i64: 8, 2>}, {pipeline_mode = #tpu.pipeline_mode<synchronous>, transform_indices = @transform_2, window_bounds = array<i64: 32, 66>}, {pipeline_mode = #tpu.pipeline_mode<synchronous>, transform_indices = @transform_3, window_bounds = array<i64: 1, 66>}, {transform_indices = @transform_4, window_bounds = array<i64: 8, 64>}, {transform_indices = @transform_5, window_bounds = array<i64: 1, 1, 2>}]} {
    %c0 = arith.constant 0 : index
    %c0_0 = arith.constant 0 : index
    %0 = vector.load %arg1[%c0, %c0_0] : memref<8x32xf32, #tpu.memory_space<vmem>>, vector<8x32xf32>
    %c0_1 = arith.constant 0 : index
    %c0_2 = arith.constant 0 : index
    %1 = vector.load %arg3[%c0_1, %c0_2] : memref<32x66xf32, #tpu.memory_space<vmem>>, vector<32x66xf32>
    %cst = arith.constant dense<0.000000e+00> : vector<8x66xf32>
    %2 = tpu.matmul %0, %1, %cst {dimension_numbers = #tpu.dot_dimension_numbers<[1], [0], [0], [1], [0, 0, 1, 1], [], []>} : vector<8x32xf32>, vector<32x66xf32>, vector<8x66xf32> -> vector<8x66xf32>
    %c0_3 = arith.constant 0 : index
    %c0_4 = arith.constant 0 : index
    %3 = vector.load %arg4[%c0_3, %c0_4] : memref<1x66xf32, #tpu.memory_space<vmem>>, vector<1x66xf32>
    %4 = vector.broadcast %3 : vector<1x66xf32> to vector<8x66xf32>
    %5 = arith.addf %2, %4 : vector<8x66xf32>
    %6 = vector.extract_strided_slice %5 {offsets = [0, 64], sizes = [8, 2], strides = [1, 1]} : vector<8x66xf32> to vector<8x2xf32>
    %c0_5 = arith.constant 0 : index
    %c0_6 = arith.constant 0 : index
    %7 = vector.load %arg2[%c0_5, %c0_6] : memref<8x2xf32, #tpu.memory_space<vmem>>, vector<8x2xf32>
    %8 = arith.addf %6, %7 : vector<8x2xf32>
    %9 = vector.extract_strided_slice %8 {offsets = [0, 0], sizes = [8, 1], strides = [1, 1]} : vector<8x2xf32> to vector<8x1xf32>
    %10 = vector.extract_strided_slice %8 {offsets = [0, 1], sizes = [8, 1], strides = [1, 1]} : vector<8x2xf32> to vector<8x1xf32>
    %11 = arith.subf %9, %10 : vector<8x1xf32>
    %12 = arith.negf %11 : vector<8x1xf32>
    %13 = math.exp %12 : vector<8x1xf32>
    %cst_7 = arith.constant 1.000000e+00 : f32
    %14 = vector.broadcast %cst_7 : f32 to vector<8x1xf32>
    %15 = arith.addf %14, %13 : vector<8x1xf32>
    %16 = arith.divf %14, %15 : vector<8x1xf32>
    %cst_8 = arith.constant 1.000000e+00 : f32
    %17 = vector.broadcast %cst_8 : f32 to vector<8x1xf32>
    %18 = arith.subf %17, %16 : vector<8x1xf32>
    %19 = tpu.concatenate %16, %18 in 1 : vector<8x1xf32>, vector<8x1xf32> -> vector<8x2xf32>
    %cst_9 = arith.constant dense<0.000000e+00> : vector<2xf32>
    %20 = vector.multi_reduction <add>, %19, %cst_9 [0] : vector<8x2xf32> to vector<2xf32>
    %21 = vector.shape_cast %20 : vector<2xf32> to vector<1x2xf32>
    %22 = vector.shape_cast %21 : vector<1x2xf32> to vector<1x1x2xf32>
    %c0_10 = arith.constant 0 : index
    %c0_11 = arith.constant 0 : index
    %c0_12 = arith.constant 0 : index
    %23 = vector.load %arg6[%c0_10, %c0_11, %c0_12] : memref<1x1x2xf32, #tpu.memory_space<vmem>>, vector<1x1x2xf32>
    tpu.vector_store %arg6[%c0_10, %c0_11, %c0_12], %22 {strides = array<i32>} : memref<1x1x2xf32, #tpu.memory_space<vmem>>, vector<1x1x2xf32>,
    %cst_13 = arith.constant dense<0xFF800000> : vector<8xf32>
    %24 = vector.multi_reduction <maximumf>, %19, %cst_13 [1] : vector<8x2xf32> to vector<8xf32>
    %25 = vector.shape_cast %24 : vector<8xf32> to vector<8x1xf32>
    %cst_14 = arith.constant 0.000000e+00 : f32
    %26 = vector.broadcast %cst_14 : f32 to vector<8x32xf32>
    %false = arith.constant false
    %27 = vector.broadcast %false : i1 to vector<8x1xi1>
    %28 = vector.extract_strided_slice %19 {offsets = [0, 0], sizes = [8, 1], strides = [1, 1]} : vector<8x2xf32> to vector<8x1xf32>
    %29 = arith.cmpf oge, %28, %25 : vector<8x1xf32>
    %cst_15 = arith.constant dense<true> : vector<8x1xi1>
    %30 = arith.xori %27, %cst_15 : vector<8x1xi1>
    %31 = arith.andi %29, %30 : vector<8x1xi1>
    %cst_16 = arith.constant 0.000000e+00 : f32
    %32 = vector.broadcast %cst_16 : f32 to vector<8x1xf32>
    %33 = arith.select %31, %28, %32 : vector<8x1xi1>, vector<8x1xf32>
    %34 = vector.extract_strided_slice %5 {offsets = [0, 0], sizes = [8, 32], strides = [1, 1]} : vector<8x66xf32> to vector<8x32xf32>
    %35 = vector.broadcast %33 : vector<8x1xf32> to vector<8x32xf32>
    %36 = arith.mulf %35, %34 : vector<8x32xf32>
    %37 = arith.addf %26, %36 : vector<8x32xf32>
    %38 = arith.ori %27, %31 : vector<8x1xi1>
    %39 = vector.extract_strided_slice %19 {offsets = [0, 1], sizes = [8, 1], strides = [1, 1]} : vector<8x2xf32> to vector<8x1xf32>
    %40 = arith.cmpf oge, %39, %25 : vector<8x1xf32>
    %cst_17 = arith.constant dense<true> : vector<8x1xi1>
    %41 = arith.xori %38, %cst_17 : vector<8x1xi1>
    %42 = arith.andi %40, %41 : vector<8x1xi1>
    %cst_18 = arith.constant 0.000000e+00 : f32
    %43 = vector.broadcast %cst_18 : f32 to vector<8x1xf32>
    %44 = arith.select %42, %39, %43 : vector<8x1xi1>, vector<8x1xf32>
    %45 = vector.extract_strided_slice %5 {offsets = [0, 32], sizes = [8, 32], strides = [1, 1]} : vector<8x66xf32> to vector<8x32xf32>
    %46 = vector.broadcast %44 : vector<8x1xf32> to vector<8x32xf32>
    %47 = arith.mulf %46, %45 : vector<8x32xf32>
    %48 = arith.addf %37, %47 : vector<8x32xf32>
    %49 = tpu.concatenate %48, %48 in 1 : vector<8x32xf32>, vector<8x32xf32> -> vector<8x64xf32>
    %c0_19 = arith.constant 0 : index
    %c0_20 = arith.constant 0 : index
    %50 = vector.load %arg5[%c0_19, %c0_20] : memref<8x64xf32, #tpu.memory_space<vmem>>, vector<8x64xf32>
    tpu.vector_store %arg5[%c0_19, %c0_20], %49 {strides = array<i32>} : memref<8x64xf32, #tpu.memory_space<vmem>>, vector<8x64xf32>,
    return
  }
  func.func @transform_0(%arg0: i32) -> (i32, i32) {
    %c0_i32 = arith.constant 0 : i32
    %c0_i32_0 = arith.constant 0 : i32
    return %arg0, %c0_i32 : i32, i32
  }
  func.func @transform_1(%arg0: i32) -> (i32, i32) {
    %c0_i32 = arith.constant 0 : i32
    %c0_i32_0 = arith.constant 0 : i32
    return %arg0, %c0_i32 : i32, i32
  }
  func.func @transform_2(%arg0: i32) -> (i32, i32) {
    %c0_i32 = arith.constant 0 : i32
    %c0_i32_0 = arith.constant 0 : i32
    %c0_i32_1 = arith.constant 0 : i32
    return %c0_i32, %c0_i32_0 : i32, i32
  }
  func.func @transform_3(%arg0: i32) -> (i32, i32) {
    %c0_i32 = arith.constant 0 : i32
    %c0_i32_0 = arith.constant 0 : i32
    %c0_i32_1 = arith.constant 0 : i32
    return %c0_i32, %c0_i32_0 : i32, i32
  }
  func.func @transform_4(%arg0: i32) -> (i32, i32) {
    %c0_i32 = arith.constant 0 : i32
    %c0_i32_0 = arith.constant 0 : i32
    return %arg0, %c0_i32 : i32, i32
  }
  func.func @transform_5(%arg0: i32) -> (i32, i32, i32) {
    %c0_i32 = arith.constant 0 : i32
    %c0_i32_0 = arith.constant 0 : i32
    %c0_i32_1 = arith.constant 0 : i32
    return %arg0, %c0_i32, %c0_i32_0 : i32, i32, i32
  }
}

</mosaic_0001>

<bundles_post_ra>
// kernel: moe_forward.1
= control target key start
LH: loop header
LB: loop body
LE: loop exit
PB: predicated region body
PF: predicated region fallthrough
CT: control target
= control target key end

     0   :  { %11 = vsyncpa [#allocation3], 0  ;;  %s845_s0 = inlined_call_operand.vmem [shape: f32[16,32], index: 0, kind: input, shape index: {}]   ;;  %s846_s1 = inlined_call_operand.vmem [shape: f32[16,2], index: 1, kind: input, shape index: {}]   ;;  %s847_s2 = inlined_call_operand.vmem [shape: f32[32,66], index: 2, kind: input, shape index: {}]   ;;  %s848_s3 = inlined_call_operand.vmem [shape: f32[1,66], index: 3, kind: input, shape index: {}]   ;;  %s849_s4 = inlined_call_operand.hbm [shape: f32[16,64], index: 4, kind: output, shape index: {0}]   ;;  %s850_s5 = inlined_call_operand.vmem [shape: f32[2,1,2], index: 5, kind: output, shape index: {1}]  }
   0x1   :  { %13 = vsyncpa [#allocation3 + $0x1], 0  ;;  %s718_s18 = smov 0   ;;  %s720_s19 = smov 0  }
   0x2   :  { %s722_s20 = smov 0   ;;  %s724_s21 = smov 0  }
   0x3 LB: > { %s739_s22 = sadd.s32 4294967295, %s673_s21   ;;  %s517_s23 = sadd.s32 4294967294, %s673_s21   ;;  %s673_s21 = sphi %s724_s21, %s856_s21   ;;  %s669_s20 = sphi %s722_s20, %s855_s20   ;;  %s665_s19 = sphi %s720_s19, %s854_s19   ;;  %s661_s18 = sphi %s718_s18, %s853_s18  }
   0x4   : > { %s743_s24 = sadd.s32 1, %s673_s21   ;;  %s120_s25 = sadd.s32 1, %s669_s20 }
   0x5   : > { %s117_s26 = ssub.s32 %s673_s21, %s743_s24  ;;  %p130_p0 = scmp.ne.s32.totalorder %s669_s20, %s665_s19 }
   0x6   : > { %p118_p1 = scmp.eq.s32.totalorder %s117_s26, 0  ;;  %p131_p2 = scmp.eq.s32.totalorder %s739_s22, 1 }
   0x7   : > { %p136_p3 = scmp.ne.s32.totalorder %s665_s19, %s661_s18  ;;  %p137_p4 = scmp.eq.s32.totalorder %s517_s23, 1 }
   0x8   : > { %s754_s27 = scalar_select %p118_p1, %s669_s20, %s120_s25  }
   0x9   : > { %p756_p5 = por %p131_p2, %p130_p0  ;;  %p760_p6 = por %p137_p4, %p136_p3 }
   0xa   : > { %p520_p7 = scmp.ge.s32.totalorder %s673_s21, 1  ;;  %p201_p8 = scmp.lt.s32.totalorder %s673_s21, 3 }
   0xc   : > { %p202_p9 = pnand %p520_p7, %p201_p8 }
   0xd   : > { %v247_v0 = vld [vmem:[%s847_s2] sm:$0xff] (!%p202_p9)  ;;  %v248_v1 = vld [vmem:[%s847_s2 + $0x8] sm:$0xff] (!%p202_p9)  ;;  %v249_v2 = vld [vmem:[%s847_s2 + $0x10] sm:$0xff] (!%p202_p9)  ;;  %v675_v3 = vmov (!%p202_p9), 0.0|0.0   ;;  %vm676_vm0 = vmmov (!%p202_p9), 0   ;;  %v677_v6 = vmov (!%p202_p9), 0.0  }
   0xe   : > { %205 = sbr.rel (%p202_p9) target bundleno = 1146 (0x47a), region = 36  ;;  %547 = vmatprep.subr.bf16.mxu0 (!%p202_p9), %v675_v3  ;;  %v548_v4 = vpack.c.bf16 (!%p202_p9), %v248_v1, %v247_v0  ;;  %v250_v5 = vld [vmem:[%s847_s2 + $0x18] sm:$0xff] (!%p202_p9)  ;;  %544 = vmatprep.mubr.msk.f32.mxu0 (!%p202_p9), %vm676_vm0, %v677_v6  ;;  %p235_p10 = scmp.lt.s32.totalorder (!%p202_p9), %s739_s22, 1  ;;  %vm258_vm1 = vcmask (!%p202_p9), 261120   ;;  %v524_v10 = vld [vmem:[%s848_s3] ss:$0 sm:$0xff] (!%p202_p9) }
   0xf   : > { %v551_v7 = vpack.c.bf16 (!%p202_p9), %v250_v5, %v249_v2  ;;  %s678_s30 = smov (!%p202_p9), 64   ;;  %s679_s8 = smov (!%p202_p9), 127   ;;  %vm358_vm2 = vcmask (!%p202_p9), 7168   ;;  %vm360_vm3 = vcmask (!%p202_p9), 15360   ;;  %vm368_vm4 = vcmask (!%p202_p9), 8192  }
  0x10   : > { %549 = vmatpush3.bf16.msra.mxu0 (!%p202_p9), %v548_v4  ;;  %s680_s9 = smov (!%p202_p9), 65   ;;  %v681_v34 = vmov (!%p202_p9), 1   ;;  %vm682_vm6 = vmmov (!%p202_p9), 1   ;;  %v683_v36 = vmov (!%p202_p9), 0   ;;  %s686_s15 = smov (!%p202_p9), 32   ;;  %vm405_vm10 = vcmask (!%p202_p9), 523264  }
  0x11   : > { %550 = vmatprep.subr.bf16.mxu0 (!%p202_p9), %v675_v3  ;;  %604 = vset.pattern.permute.xlu1 (!%p202_p9), %v681_v34  ;;  %s227_s16 = sand.u32 (!%p202_p9), 1, %s665_s19   ;;  %s528_s23 = sshll.u32 (!%p202_p9), %s739_s22, 7 }
  0x12   : > { %606 = vset.pattern.permute.xlu0 (!%p202_p9), %v681_v34  ;;  %s802_s7 = scalar_lea.hbm (!%p202_p9), %s849_s4, %s528_s23 }
  0x14   : > { %552 = vmatpush3.bf16.msra.mxu0 (!%p202_p9), %v551_v7 }
  0x15   : > { %s780_s13 = scalar_select %p235_p10, %s739_s22, 1 }
  0x16   : > { %s687_s22 = smov [#allocation2]  }
  0x17   : > { %s522_s14 = sshll.u32 %s780_s13, 3  ;;  %s245_s12 = scalar_lea.vmem %s850_s5, %s780_s13 }
  0x18   : > { %s238_s17 = scalar_lea.vmem %s845_s0, %s522_s14  ;;  %s242_s26 = scalar_lea.vmem %s846_s1, %s522_s14 }
  0x19   : > { %v246_v8 = vld [vmem:[%s238_s17] sm:$0xff]  ;;  %s684_s14 = smov 1   ;;  %s685_s13 = smov 96  }
  0x1a   : > { %v332_v9 = vld [vmem:[%s242_s26] sm:$0xff]  ;;  %545 = vmatmul.mubr.msk.f32.vlgmr.msra.gmra.mrb[0].mxu0 %vm258_vm1, %v246_v8  ;;  %s521_s17 = sshll.u32 %s227_s16, 3  ;;  %s615_s10 = sshll.u32 %s687_s22, 4  ;;  %s616_s10 = int_to_ptr.vmem [resolvable:$false] %s615_s10 }
  0x1b   : > { %334 = vrot.lane.b32.xlu0 %v332_v9, %s678_s30  ;;  %s229_s25 = scalar_lea.vmem [#allocation2], %s521_s17  ;;  %s617_s11 = scalar_lea.vmem %s616_s10, 256 }
  0x1c   : > { %s424_s26 = sshll.u32 %s229_s25, 4  ;;  %s804_s26 = int_to_ptr.vmem [resolvable:$true] %s424_s26 }
  0x1d   : > { %p618_p0 = scmp.lt.s32.totalorder %s804_s26, %s616_s10 }
  0x8d   : > { %v335_v12 = vpop.permute.xlu0 %334 }
  0xed   : > { %v328_v11 = vpop.f32.mrb[0].mxu0 }
  0xee   : > { %v329_v13 = vadd.f32 %v524_v10, %v328_v11  ;;  %v546_v14 = vpop.f32.mrb[1].mxu0 }
  0xf0   : > { %v337_v15 = vadd.f32 %v335_v12, %v329_v13 }
  0xf2   : > { %339 = vrot.lane.b32.xlu0 %v337_v15, %s679_s8  ;;  %s408_s8 = scalar_lea.sflag [#allocation3], %s227_s16 }
 0x164   : > { %v340_v16 = vpop.permute.xlu0 %339 }
 0x165   : > { %v342_v17 = vsub.f32 %v337_v15, %v340_v16 }
 0x167   : > { %v526_v18 = vmul.f32 -1.442695, %v342_v17 }
 0x169   : > { %607 = vpow2.f32 %v526_v18 }
 0x173   : > { %v608_v19 = vpop.eup %607 }
 0x174   : > { %v346_v20 = vadd.f32 1.0, %v608_v19 }
 0x176   : > { %609 = vrcp.f32 %v346_v20 }
 0x180   : > { %v610_v21 = vpop.eup %609 }
 0x181   : > { %351 = vrot.lane.b32.xlu1 %v610_v21, %s678_s30  ;;  %v349_v22 = vsub.f32 1.0, %v610_v21 }
 0x185   : > { %355 = vrot.lane.b32.xlu1 %v349_v22, %s680_s9  ;;  %s611_s9 = scalar_lea.vmem %s804_s26, 128 }
 0x186   : > { %p612_p11 = scmp.ne.s32.totalorder %s804_s26, %s611_s9  ;;  %p619_p1 = scmp.lt.s32.totalorder %s617_s11, %s611_s9 }
 0x188   : > { %p613_p12 = pnand %p612_p11, %p756_p5  ;;  %p620_p2 = por %p619_p1, %p618_p0 }
 0x18a   : > { %p614_p13 = pneg %p613_p12 }
 0x18c   : > { %p621_p3 = pnand %p620_p2, %p614_p13 }
 0x1f3   : > { %v352_v23 = vpop.permute.xlu1 %351 }
 0x1f7   : > { %v356_v24 = vpop.permute.xlu1 %355 }
 0x1f8   : > { %v359_v25 = vsel %vm358_vm2, %v352_v23, %v356_v24 }
 0x1f9   : > { %v370_v26 = vsel %vm360_vm3, %v359_v25, -inf  ;;  %v361_v27 = vsel %vm360_vm3, %v359_v25, 0.0 }
 0x1fa   : > { %371 = vmax.xlane.f32.xlu0 %v370_v26  ;;  %v362_v28 = vrot.slane %v361_v27, 4 }
 0x1fc   : > { %v363_v29 = vadd.f32 %v362_v28, %v361_v27 }
 0x1fe   : > { %v364_v30 = vrot.slane %v363_v29, 2 }
 0x200   : > { %v365_v31 = vadd.f32 %v364_v30, %v363_v29 }
 0x202   : > { %v366_v32 = vrot.slane %v365_v31, 1 }
 0x204   : > { %v367_v33 = vadd.f32 %v366_v32, %v365_v31 }
 0x206   : > { %369 = vst.msk [vmem:[%s245_s12] sm:$0x1] %vm368_vm4, %v367_v33 }
 0x287   : > { %v372_v35 = vpop.xlane.xlu0 %371 }
 0x288   : > { %vm373_vm5 = vcmp.ge.f32.partialorder %v359_v25, %v372_v35 }
 0x289   : > { %vm382_vm7 = vmxor %vm373_vm5, %vm682_vm6  ;;  %v374_v40 = vsel %vm373_vm5, %v359_v25, 0.0 }
 0x28a   : > { %v383_v37 = vsel %vm382_vm7, 1, %v683_v36 }
 0x28b   : > { %384 = vrot.lane.b32.xlu1 %v383_v37, %s684_s14 }
 0x2fd   : > { %v385_v38 = vpop.permute.xlu1 %384 }
 0x2fe   : > { %vm386_vm8 = vcmp.ne.s32.totalorder %v385_v38, 0 }
 0x2ff   : > { %vm387_vm9 = vmand %vm373_vm5, %vm386_vm8 }
 0x300   : > { %v388_v39 = vsel %vm387_vm9, %v359_v25, 0.0 }
 0x301   : > { %391 = vperm.xlu1 %604, %v388_v39  }
 0x305   : > { %605 = vset.pattern.permute.xlu1 %v683_v36 }
 0x306   : > { %377 = vperm.xlu1 %605, %v374_v40  }
 0x380   : > { %v392_v41 = vpop.permute.xlu1 %391 }
 0x381   : > { %v394_v42 = vmul.f32 %v392_v41, %v329_v13 }
 0x383   : > { %396 = vrot.lane.b32.xlu1 %v394_v42, %s685_s13 }
 0x385   : > { %v378_v43 = vpop.permute.xlu1 %377 }
 0x386   : > { %v380_v44 = vmul.f32 %v378_v43, %v329_v13 }
 0x3f5   : > { %v397_v45 = vpop.permute.xlu1 %396 }
 0x3f6   : > { %v399_v46 = vadd.f32 %v397_v45, %v380_v44 }
 0x3f8   : > { %401 = vrot.lane.b32.xlu1 %v399_v46, %s686_s15 }
 0x46a   : > { %v402_v47 = vpop.permute.xlu1 %401 }
 0x46b   : > { %v404_v48 = vsel %vm258_vm1, %v399_v46, %v402_v47 }
 0x46c   : > { %406 = vst.msk [vmem:[%s229_s25] sm:$0xff] %vm405_vm10, %v404_v48 }
 0x46d   : > { %624 = shalt.err (!%p621_p3)
}
 0x46e   : > { %s625_s12 = scalar_lea.hbm %s802_s7, 128  ;;  %s629_s15 = scalar_lea.hbm %s849_s4, 256 }
 0x46f   : > { %p626_p4 = scmp.ne.s32.totalorder %s802_s7, %s625_s12  ;;  %p630_p9 = scmp.lt.u32.totalorder %s802_s7, %s849_s4 }
 0x470   : > { %p631_p10 = scmp.lt.u32.totalorder %s629_s15, %s625_s12  ;;  %p633_p12 = scmp.lt.u32.totalorder %s625_s12, %s802_s7 }
 0x471   : > { %p627_p7 = pnand %p626_p4, %p756_p5 }
 0x472   : > { %p632_p11 = por %p631_p10, %p630_p9 }
 0x473   : > { %p628_p8 = pneg %p627_p7 }
 0x474   : > { %p634_p13 = por %p633_p12, %p632_p11 }
 0x476   : > { %p635_p0 = pnand %p634_p13, %p628_p8 }
 0x478   : > { %638 = shalt.err (!%p635_p0)
}
 0x479   : > { %553 = dma.vmem_to_hbm [thread:$0]  (%p756_p5), %s804_s26, 128, %s802_s7, %s408_s8  }
 0x47a PF: > { %p559_p1 = scmp.ge.s32.totalorder %s673_s21, 2  ;;  %s439_s23 = sand.u32 1, %s661_s18  }
 0x47b   : > { %s440_s25 = scalar_lea.sflag [#allocation3], %s439_s23 }
 0x47c   : > { %p556_p2 = pnand %p559_p1, %p760_p6 }
 0x47e   : > { %656 = dma.done.wait (!%p556_p2), %s440_s25, 128  }
 0x47f   : > { %658 = vsyncadd (!%p556_p2), %s440_s25, 4294967168  ;;  %p16_p3 = scmp.ge.s32.totalorder %s743_s24, 4   ;;  %s853_s18 = smov %s665_s19 }
 0x480   : > { %s854_s19 = smov %s669_s20  ;;  %s855_s20 = smov %s754_s27 }
 0x481   : > { %s856_s21 = smov %s743_s24  ;;  %18 = sbr.rel (!%p16_p3) target bundleno = 3 (0x3), region = 86 }
 0x488   :  { %451 = vsyncpa [#allocation3], 1 }
 0x489   :  { %453 = vsyncpa [#allocation3 + $0x1], 1 }

</bundles_post_ra>
